<compile_context>
chip_gen: v7x
topology: tpu7x:2x2x1
jax: 0.10.0
libtpu: 0.0.40
codegen_flags: <defaults>
</compile_context>

<pallas_src>
import functools

import jax
import jax.numpy as jnp
import numpy as np
from jax.experimental import pallas as pl
from jax.experimental.pallas import tpu as pltpu


def _round_up(n, m):
    return ((n + m - 1) // m) * m


def _largest_tile(n, cap):
    """Largest multiple-of-128 divisor of n (n % 128 == 0) that is <= cap."""
    cap = max(128, min(cap, n))
    best = 128
    for t in range(128, cap + 1, 128):
        if n % t == 0:
            best = t
    return best


@functools.lru_cache(maxsize=None)
def _vmem_budget():
    """(block budget, scoped vmem limit) in bytes, derived from the chip.

    v7x has only 64 MiB of VMEM per TensorCore; v5e/v6e have 128 MiB but a
    much smaller scoped default, so we raise the limit explicitly.
    """
    phys = 64 * 1024 * 1024                     # conservative default (v7x)
    try:
        info = pltpu.get_tpu_info()
        cap = getattr(info, "vmem_capacity_bytes", None)
        if cap:
            phys = int(cap)
    except Exception:
        pass
    phys = max(32 * 1024 * 1024, min(phys, 128 * 1024 * 1024))
    budget = int(phys * 0.60)                   # what double-buffered blocks may use
    limit = int(phys * 0.80)                    # scoped limit handed to Mosaic
    return budget, limit


def build_operator(weights, size, d, loop):
    """Fold the entire ordered sweep into one padded (s2p, s2p) operator.

    Returns At_pad (f32) such that  out_flat = x_flat @ At_pad  (restricted to
    the first size*size rows/cols) reproduces the PyTorch forward exactly.
    Built host-side in float64; each step only touches the (2d+1)^2 window
    rows, so the build is O(loop * (s-2d)^2 * (2d+1)^2 * s^2).
    Call ONCE per parameter set (hoist out of the forward).
    """
    W = np.asarray(jax.device_get(weights), dtype=np.float64)
    win = 2 * d + 1
    s2 = size * size
    A = np.eye(s2, dtype=np.float64)
    for _ in range(loop):
        for x in range(d, size - d):            # x outer (matches PyTorch)
            for y in range(d, size - d):        # y inner
                k = y * size + x
                row_k = A[k, :].copy()          # v is read BEFORE the update
                ys = np.arange(y - d, y + d + 1)
                xs = np.arange(x - d, x + d + 1)
                rows = (ys[:, None] * size + xs[None, :]).reshape(-1)
                coeff = W[y, x].reshape(-1).copy()
                coeff[d * win + d] -= 1.0       # center zeroed before the +=
                A[rows, :] += coeff[:, None] * row_k[None, :]
    s2p = _round_up(s2, 128)                    # lane-dense, full MXU tiles
    At = np.zeros((s2p, s2p), dtype=np.float32)
    At[:s2, :s2] = A.T.astype(np.float32)       # out = x @ A^T
    return jnp.asarray(At)


def _gemm_kernel(x_ref, a_ref, o_ref):
    # Single-K path: whole reduction in one MXU call, no scratch, no extra
    # accumulator read/write pass.
    o_ref[...] = jnp.dot(x_ref[...], a_ref[...],
                         preferred_element_type=jnp.float32).astype(o_ref.dtype)


def _gemm_acc_kernel(x_ref, a_ref, o_ref, acc_ref):
    # K-tiled fallback for operators too large to keep a resident K panel.
    @pl.when(pl.program_id(2) == 0)
    def _():
        acc_ref[...] = jnp.zeros_like(acc_ref)

    acc_ref[...] += jnp.dot(x_ref[...], a_ref[...],
                            preferred_element_type=jnp.float32)

    @pl.when(pl.program_id(2) == pl.num_programs(2) - 1)
    def _():
        o_ref[...] = acc_ref[...].astype(o_ref.dtype)


def graph_forward(x, a_op, *, size):
    """x: (B, size*size) float  ->  (B, size*size) float32.

    a_op: padded operator from build_operator (hoisted out of the forward).
    """
    B = x.shape[0]
    s2 = size * size
    s2p = a_op.shape[0]
    budget, vmem_limit = _vmem_budget()

    # Batch tile covers the whole padded batch when feasible so the operator
    # never has to be re-streamed per batch tile.
    if B <= 256:
        bp = _round_up(B, 8)
        tb = bp
    else:
        bp = _round_up(B, 256)
        tb = 256

    # Preferred plan: single K tile (resident A column panel), no accumulator.
    # Pick the largest N panel that fits the per-chip VMEM budget (double
    # buffers for x / A panel / out accounted).
    plan = None
    for cap in (s2p, 2048, 1024, 512, 256, 128):
        tn = _largest_tile(s2p, cap)
        need = 4 * (2 * s2p * tn + 2 * tb * s2p + 2 * tb * tn)
        if need <= budget:
            plan = ("single_k", tn, s2p)
            break
    if plan is None:
        # Very large operators only: K-tiled with an f32 accumulator.
        for cap in (1024, 512, 256, 128):
            tn = _largest_tile(s2p, cap)
            tk = tn
            need = 4 * (2 * tb * tk + 2 * tk * tn + 2 * tb * tn + tb * tn)
            if need <= budget or cap == 128:
                plan = ("k_tiled", tn, tk)
                break

    xp = jnp.zeros((bp, s2p), jnp.float32)
    xp = xp.at[:B, :s2].set(x.astype(jnp.float32))

    if plan[0] == "single_k":
        _, tn, _ = plan
        # Grid order (j outer, i inner): the A block index depends only on j,
        # so each A panel is DMA'd exactly once and reused across all batch
        # tiles -> A makes a single pass over HBM regardless of B.
        out_p = pl.pallas_call(
            _gemm_kernel,
            out_shape=jax.ShapeDtypeStruct((bp, s2p), jnp.float32),
            grid_spec=pltpu.PrefetchScalarGridSpec(
                num_scalar_prefetch=0,
                grid=(s2p // tn, bp // tb),
                in_specs=[
                    pl.BlockSpec((tb, s2p), lambda j, i: (i, 0)),
                    pl.BlockSpec((s2p, tn), lambda j, i: (0, j)),
                ],
                out_specs=pl.BlockSpec((tb, tn), lambda j, i: (i, j)),
            ),
            compiler_params=pltpu.CompilerParams(
                dimension_semantics=("parallel", "parallel"),
                vmem_limit_bytes=vmem_limit,
            ),
        )(xp, a_op)
    else:
        _, tn, tk = plan
        out_p = pl.pallas_call(
            _gemm_acc_kernel,
            out_shape=jax.ShapeDtypeStruct((bp, s2p), jnp.float32),
            grid_spec=pltpu.PrefetchScalarGridSpec(
                num_scalar_prefetch=0,
                grid=(bp // tb, s2p // tn, s2p // tk),
                in_specs=[
                    pl.BlockSpec((tb, tk), lambda i, j, k: (i, k)),
                    pl.BlockSpec((tk, tn), lambda i, j, k: (k, j)),
                ],
                out_specs=pl.BlockSpec((tb, tn), lambda i, j, k: (i, j)),
                scratch_shapes=[pltpu.VMEM((tb, tn), jnp.float32)],
            ),
            compiler_params=pltpu.CompilerParams(
                dimension_semantics=("parallel", "parallel", "arbitrary"),
                vmem_limit_bytes=vmem_limit,
            ),
        )(xp, a_op)

    return out_p[:B, :s2]


def reference_forward(x, weights, *, size, d, loop):
    """Pure numpy transcription of the PyTorch forward (for validation)."""
    B = x.shape[0]
    u = np.asarray(x, dtype=np.float64).reshape(B, size, size).copy()
    W = np.asarray(weights, dtype=np.float64)
    for _ in range(loop):
        for xx in range(d, size - d):
            for yy in range(d, size - d):
                v = u[:, yy, xx].copy()
                c = u.copy()
                c[:, yy, xx] = 0.0
                c[:, yy - d:yy + d + 1, xx - d:xx + d + 1] += (
                    v[:, None, None] * W[yy, xx][None]
                )
                u = c
    return u.reshape(B, -1)


if __name__ == "__main__":
    size, d, loop = 8, 1, 2
    batch = 2

    key = jax.random.PRNGKey(0)
    kw, kx = jax.random.split(key)
    # nn.Parameter((high - low) * rand(shape) + low), low/high = -0.5/0.5
    weights = jax.random.uniform(
        kw, (size, size, 2 * d + 1, 2 * d + 1),
        dtype=jnp.float32, minval=-0.5, maxval=0.5)
    x = jax.random.normal(kx, (batch, size * size), dtype=jnp.float32)

    # Build the folded sweep operator ONCE per parameter set (hoisted).
    a_op = build_operator(weights, size, d, loop)

    out = graph_forward(x, a_op, size=size)
    out = jax.block_until_ready(out)

    ref = reference_forward(np.asarray(x), np.asarray(weights),
                            size=size, d=d, loop=loop)
    np.testing.assert_allclose(np.asarray(out), ref, rtol=1e-4, atol=1e-4)

    print("KERNEL_OK")
</pallas_src>

<mosaic_0001>
module attributes {stable_mosaic.version = 11 : i64} {
  func.func @_gemm_kernel(%arg0: i32, %arg1: i32, %arg2: memref<8x128xf32, #tpu.memory_space<vmem>>, %arg3: memref<128x128xf32, #tpu.memory_space<vmem>>, %arg4: memref<8x128xf32, #tpu.memory_space<vmem>>) attributes {dimension_semantics = [#tpu.dimension_semantics<parallel>, #tpu.dimension_semantics<parallel>], iteration_bounds = array<i64: 1, 1>, scalar_prefetch = 0 : i64, scratch_operands = 0 : i64, tpu.core_type = #tpu.core_type<tc>, window_params = [{transform_indices = @transform_0, window_bounds = array<i64: 8, 128>}, {transform_indices = @transform_1, window_bounds = array<i64: 128, 128>}, {transform_indices = @transform_2, window_bounds = array<i64: 8, 128>}]} {
    %c0 = arith.constant 0 : index
    %c0_0 = arith.constant 0 : index
    %0 = vector.load %arg2[%c0, %c0_0] : memref<8x128xf32, #tpu.memory_space<vmem>>, vector<8x128xf32>
    %c0_1 = arith.constant 0 : index
    %c0_2 = arith.constant 0 : index
    %1 = vector.load %arg3[%c0_1, %c0_2] : memref<128x128xf32, #tpu.memory_space<vmem>>, vector<128x128xf32>
    %cst = arith.constant dense<0.000000e+00> : vector<8x128xf32>
    %2 = tpu.matmul %0, %1, %cst {dimension_numbers = #tpu.dot_dimension_numbers<[1], [0], [0], [1], [0, 0, 1, 1], [], []>} : vector<8x128xf32>, vector<128x128xf32>, vector<8x128xf32> -> vector<8x128xf32>
    %c0_3 = arith.constant 0 : index
    %c0_4 = arith.constant 0 : index
    %3 = vector.load %arg4[%c0_3, %c0_4] : memref<8x128xf32, #tpu.memory_space<vmem>>, vector<8x128xf32>
    tpu.vector_store %arg4[%c0_3, %c0_4], %2 {strides = array<i32>} : memref<8x128xf32, #tpu.memory_space<vmem>>, vector<8x128xf32>,
    return
  }
  func.func @transform_0(%arg0: i32, %arg1: i32) -> (i32, i32) {
    %c0_i32 = arith.constant 0 : i32
    %c0_i32_0 = arith.constant 0 : i32
    return %arg1, %c0_i32 : i32, i32
  }
  func.func @transform_1(%arg0: i32, %arg1: i32) -> (i32, i32) {
    %c0_i32 = arith.constant 0 : i32
    %c0_i32_0 = arith.constant 0 : i32
    return %c0_i32, %arg0 : i32, i32
  }
  func.func @transform_2(%arg0: i32, %arg1: i32) -> (i32, i32) {
    %c0_i32 = arith.constant 0 : i32
    return %arg1, %arg0 : i32, i32
  }
}

</mosaic_0001>

<bundles_post_ra>
// kernel: tpu_custom_call.1
= control target key start
LH: loop header
LB: loop body
LE: loop exit
PB: predicated region body
PF: predicated region fallthrough
CT: control target
= control target key end

     0   :  { %7 = vsyncpa [#allocation3], 0  ;;  %s364_s0 = inlined_call_operand.hbm [shape: f32[8,128], index: 0, kind: input, shape index: {}]   ;;  %s365_s1 = inlined_call_operand.hbm [shape: f32[128,128], index: 1, kind: input, shape index: {}]   ;;  %s366_s2 = inlined_call_operand.hbm [shape: f32[8,128], index: 2, kind: output, shape index: {}]  }
   0x1   :  { %8 = vsyncpa [#allocation6], 0 }
   0x2   :  { %9 = vsyncpa [#allocation4], 0  ;;  %s298_s9 = smov [#allocation2]   ;;  %s299_s11 = smov [#allocation5]  }
   0x3   :  { %s16_s10 = sshll.u32 %s298_s9, 4  ;;  %s25_s12 = sshll.u32 %s299_s11, 4  ;;  %s17_s10 = int_to_ptr.vmem [resolvable:$true] %s16_s10  ;;  %s321_s12 = int_to_ptr.vmem [resolvable:$true] %s25_s12 }
   0x4   :  { %s226_s15 = scalar_lea.hbm %s364_s0, 128 }
   0x5   :  { %p227_p0 = scmp.ne.s32.totalorder %s364_s0, %s226_s15  ;;  %p230_p1 = scmp.lt.u32.totalorder %s226_s15, %s364_s0 }
   0x7   :  { %p232_p2 = pnand %p230_p1, %p227_p0 }
   0x9   :  { %235 = shalt.err (!%p232_p2)
}
   0xa   :  { %s236_s20 = scalar_lea.vmem %s17_s10, 128  ;;  %p241_p4 = scmp.lt.s32.totalorder %s17_s10, %s17_s10 }
   0xb   :  { %p237_p3 = scmp.ne.s32.totalorder %s17_s10, %s236_s20  ;;  %p242_p5 = scmp.lt.s32.totalorder %s236_s20, %s236_s20 }
   0xd   :  { %p243_p6 = por %p242_p5, %p241_p4 }
   0xf   :  { %p244_p7 = pnand %p243_p6, %p237_p3 }
  0x11   :  { %247 = shalt.err (!%p244_p7)
}
  0x12   :  { %19 = dma.hbm_to_vmem [thread:$0]  %s364_s0, 128, %s17_s10, [#allocation3]  }
  0x13   :  { %s248_s25 = scalar_lea.hbm %s365_s1, 2048 }
  0x14   :  { %p249_p8 = scmp.ne.s32.totalorder %s365_s1, %s248_s25  ;;  %p252_p9 = scmp.lt.u32.totalorder %s248_s25, %s365_s1 }
  0x16   :  { %p254_p10 = pnand %p252_p9, %p249_p8 }
  0x18   :  { %257 = shalt.err (!%p254_p10)
}
  0x19   :  { %s258_s30 = scalar_lea.vmem %s321_s12, 2048  ;;  %p263_p12 = scmp.lt.s32.totalorder %s321_s12, %s321_s12 }
  0x1a   :  { %p259_p11 = scmp.ne.s32.totalorder %s321_s12, %s258_s30  ;;  %p264_p13 = scmp.lt.s32.totalorder %s258_s30, %s258_s30 }
  0x1c   :  { %p265_p0 = por %p264_p13, %p263_p12 }
  0x1e   :  { %p266_p1 = pnand %p265_p0, %p259_p11 }
  0x20   :  { %269 = shalt.err (!%p266_p1)
}
  0x21   :  { %s300_s0 = smov 128   ;;  %s301_s3 = smov 8  }
  0x22   :  { %31 = dma.hbm_to_vmem [thread:$0]  %s365_s1, 2048, %s321_s12, [#allocation6], %s300_s0, %s300_s0, %s301_s3  }
  0x23   :  { %292 = dma.done.wait [#allocation3], 128  }
  0x24   :  { %293 = vsyncadd [#allocation3], 4294967168 }
  0x25   :  { %294 = dma.done.wait [#allocation6], 2048  }
  0x26   :  { %295 = vsyncadd [#allocation6], 4294965248  ;;  %v302_v0 = vmov 0.0|0.0   ;;  %vm303_vm0 = vmmov 0   ;;  %v304_v1 = vmov 0.0   ;;  %v39_v2 = vld [vmem:[#allocation5] sm:$0xff] }
  0x27   :  { %194 = vmatprep.subr.bf16.mxu0 %v302_v0  ;;  %191 = vmatprep.mubr.msk.f32.mxu0 %vm303_vm0, %v304_v1  ;;  %v40_v3 = vld [vmem:[#allocation5 + $0x8] sm:$0xff]  ;;  %v41_v4 = vld [vmem:[#allocation5 + $0x10] sm:$0xff]  ;;  %v42_v6 = vld [vmem:[#allocation5 + $0x18] sm:$0xff]  ;;  %s305_s1 = smov [#allocation7]  }
  0x28   :  { %v195_v5 = vpack.c.bf16 %v40_v3, %v39_v2  ;;  %v198_v7 = vpack.c.bf16 %v42_v6, %v41_v4  ;;  %v43_v8 = vld [vmem:[#allocation5 + $0x20] sm:$0xff]  ;;  %v44_v9 = vld [vmem:[#allocation5 + $0x28] sm:$0xff]  ;;  %v45_v11 = vld [vmem:[#allocation5 + $0x30] sm:$0xff]  ;;  %s132_s6 = sshll.u32 %s305_s1, 4  ;;  %s133_s6 = int_to_ptr.vmem [resolvable:$true] %s132_s6 }
  0x29   :  { %v201_v10 = vpack.c.bf16 %v44_v9, %v43_v8  ;;  %v46_v12 = vld [vmem:[#allocation5 + $0x38] sm:$0xff]  ;;  %v47_v14 = vld [vmem:[#allocation5 + $0x40] sm:$0xff]  ;;  %v48_v15 = vld [vmem:[#allocation5 + $0x48] sm:$0xff]  ;;  %s270_s7 = scalar_lea.vmem %s133_s6, 128  ;;  %p275_p3 = scmp.lt.s32.totalorder %s133_s6, %s133_s6 }
  0x2a   :  { %196 = vmatpush3.bf16.msra.mxu0 %v195_v5  ;;  %v204_v13 = vpack.c.bf16 %v46_v12, %v45_v11  ;;  %v207_v16 = vpack.c.bf16 %v48_v15, %v47_v14  ;;  %v49_v17 = vld [vmem:[#allocation5 + $0x50] sm:$0xff]  ;;  %v50_v18 = vld [vmem:[#allocation5 + $0x58] sm:$0xff]  ;;  %v51_v20 = vld [vmem:[#allocation5 + $0x60] sm:$0xff]  ;;  %p271_p2 = scmp.ne.s32.totalorder %s133_s6, %s270_s7  ;;  %p276_p4 = scmp.lt.s32.totalorder %s270_s7, %s270_s7 }
  0x2b   :  { %197 = vmatprep.subr.bf16.mxu0 %v302_v0  ;;  %v210_v19 = vpack.c.bf16 %v50_v18, %v49_v17  ;;  %v52_v21 = vld [vmem:[#allocation5 + $0x68] sm:$0xff]  ;;  %v53_v23 = vld [vmem:[#allocation5 + $0x70] sm:$0xff]  ;;  %v54_v24 = vld [vmem:[#allocation5 + $0x78] sm:$0xff] }
  0x2c   :  { %v213_v22 = vpack.c.bf16 %v52_v21, %v51_v20  ;;  %v216_v25 = vpack.c.bf16 %v54_v24, %v53_v23  ;;  %v38_v26 = vld [vmem:[#allocation2] sm:$0xff]  ;;  %p277_p5 = por %p276_p4, %p275_p3 }
  0x2e   :  { %199 = vmatpush3.bf16.msra.mxu0 %v198_v7  ;;  %p278_p6 = pnand %p277_p5, %p271_p2 }
  0x2f   :  { %200 = vmatprep.subr.bf16.mxu0 %v302_v0 }
  0x32   :  { %202 = vmatpush3.bf16.msra.mxu0 %v201_v10 }
  0x33   :  { %203 = vmatprep.subr.bf16.mxu0 %v302_v0 }
  0x36   :  { %205 = vmatpush3.bf16.msra.mxu0 %v204_v13 }
  0x37   :  { %206 = vmatprep.subr.bf16.mxu0 %v302_v0 }
  0x3a   :  { %208 = vmatpush3.bf16.msra.mxu0 %v207_v16 }
  0x3b   :  { %209 = vmatprep.subr.bf16.mxu0 %v302_v0 }
  0x3e   :  { %211 = vmatpush3.bf16.msra.mxu0 %v210_v19 }
  0x3f   :  { %212 = vmatprep.subr.bf16.mxu0 %v302_v0 }
  0x42   :  { %214 = vmatpush3.bf16.msra.mxu0 %v213_v22 }
  0x43   :  { %215 = vmatprep.subr.bf16.mxu0 %v302_v0 }
  0x46   :  { %217 = vmatpush3.bf16.msra.mxu0 %v216_v25 }
  0x49   :  { %192 = vmatmul.mubr.f32.vlgmr.msra.gmra.mrb[0].mxu0 %v38_v26 }
 0x11c   :  { %v121_v27 = vpop.f32.mrb[0].mxu0 }
 0x11d   :  { %125 = vst [vmem:[#allocation7] sm:$0xff] %v121_v27  ;;  %v193_v28 = vpop.f32.mrb[1].mxu0 }
 0x11e   :  { %281 = shalt.err (!%p278_p6)
}
 0x11f   :  { %s282_s10 = scalar_lea.hbm %s366_s2, 128 }
 0x120   :  { %p283_p7 = scmp.ne.s32.totalorder %s366_s2, %s282_s10  ;;  %p286_p8 = scmp.lt.u32.totalorder %s282_s10, %s366_s2 }
 0x122   :  { %p288_p9 = pnand %p286_p8, %p283_p7 }
 0x124   :  { %291 = shalt.err (!%p288_p9)
}
 0x125   :  { %135 = dma.vmem_to_hbm [thread:$0]  %s133_s6, 128, %s366_s2, [#allocation4]  }
 0x126   :  { %296 = dma.done.wait [#allocation4], 128  }
 0x127   :  { %297 = vsyncadd [#allocation4], 4294967168 }
 0x128   :  { %139 = vsyncpa [#allocation3], 1 }
 0x129   :  { %140 = vsyncpa [#allocation6], 1 }
 0x12a   :  { %141 = vsyncpa [#allocation4], 1 }

</bundles_post_ra>
